<compile_context>
chip_gen: v7x
topology: tpu7x:2x2x1
jax: 0.10.0
libtpu: 0.0.40
codegen_flags: <defaults>
</compile_context>

<pallas_src>
import functools

import jax
import jax.numpy as jnp
from jax import lax
from jax.experimental import pallas as pl
from jax.experimental.pallas import tpu as pltpu


def _round_up(x, m):
    return ((x + m - 1) // m) * m


@functools.lru_cache(maxsize=None)
def _vmem_limit():
    """Per-generation VMEM budget: ~80% of physical, conservative fallback."""
    try:
        cap = int(pltpu.get_tpu_info().vmem_capacity_bytes)
    except Exception:
        cap = 64 * 1024 * 1024        # v7x-safe fallback
    return max(32 * 1024 * 1024, (cap * 4) // 5)


def _pick_tiles(n, max_tm=256, max_tk=512):
    """Power-of-two dst/src tiles; guarantees both divide N_pad."""
    # TODO(synk): per-generation tuning - tm=128 + pl.Buffered(3) on v5e,
    # 256-wide output lanes on v6e/v7x when the true C_out exceeds 128.
    tm = min(max_tm, pl.next_power_of_2(max(n, 8)))
    tk = min(max_tk, pl.next_power_of_2(max(n, 128)))
    n_pad = _round_up(n, max(tm, tk))
    return tm, tk, n_pad


# ---------------- kernel 1: per-relation feature transform  XR[r] = x @ W_r ----------------- #

def _rel_transform_kernel(x_ref, w_ref, xr_ref):
    xr_ref[0] = jnp.dot(x_ref[...], w_ref[0],
                        preferred_element_type=jnp.float32).astype(xr_ref.dtype)


def rel_transform(x, W, tn):
    """x:[N,Ci] bf16   W:[R,Ci,Co] bf16   ->  XR:[R,N,Co] bf16."""
    N, C_in = x.shape
    R, _, C_out = W.shape
    return pl.pallas_call(
        _rel_transform_kernel,
        out_shape=jax.ShapeDtypeStruct((R, N, C_out), jnp.bfloat16),
        grid_spec=pltpu.PrefetchScalarGridSpec(
            num_scalar_prefetch=0,
            grid=(R, N // tn),
            in_specs=[
                pl.BlockSpec((tn, C_in), lambda r, n: (n, 0)),            # x row tile
                pl.BlockSpec((1, C_in, C_out), lambda r, n: (r, 0, 0)),   # W[r]
            ],
            out_specs=pl.BlockSpec((1, tn, C_out), lambda r, n: (r, n, 0)),
        ),
        compiler_params=pltpu.CompilerParams(
            dimension_semantics=("parallel", "parallel"),
            vmem_limit_bytes=_vmem_limit(),
        ),
    )(x, W)


# ---------------- kernel 2: dst-tiled aggregation over (relation, src-tile) ----------------- #

def _rgcn_agg_kernel(mask_ref, eff_i_ref, eff_r_ref, eff_k_ref,
                     x_ref, rootw_ref, bias_ref, A_ref, xr_ref,
                     out_ref, acc_ref, *, apply_relu):
    del eff_i_ref, eff_r_ref, eff_k_ref   # only used by the index_maps
    i = pl.program_id(0)                  # dst-node tile   ("parallel")
    r = pl.program_id(1)                  # relation        ("arbitrary")
    k = pl.program_id(2)                  # src-node tile   ("arbitrary", innermost)
    num_r = pl.num_programs(1)
    num_k = pl.num_programs(2)
    p = (i * num_r + r) * num_k + k       # flat grid position for the SMEM mask

    # Init: root transform + bias into the f32 VMEM accumulator (resident over r,k).
    @pl.when(jnp.logical_and(r == 0, k == 0))
    def _():
        acc_ref[...] = (
            jnp.dot(x_ref[...], rootw_ref[...], preferred_element_type=jnp.float32)
            + bias_ref[...]
        )

    # Empty (i,r,k) adjacency blocks: index_maps already suppressed the DMA by
    # re-using the previous block; this guard ensures the stale data is never read.
    @pl.when(mask_ref[p] != 0)
    def _():
        acc_ref[...] += jnp.dot(A_ref[0], xr_ref[0],
                                preferred_element_type=jnp.float32)

    # Finalize: single cast/store to the output dtype at the last (r,k) step.
    @pl.when(jnp.logical_and(r == num_r - 1, k == num_k - 1))
    def _():
        res = acc_ref[...]
        if apply_relu:
            res = jnp.maximum(res, 0.0)
        out_ref[...] = res.astype(out_ref.dtype)


def rgcn_layer(x, root_w, bias, A, W, block_mask, eff_i, eff_r, eff_k,
               *, tm, tk, apply_relu, out_dtype):
    """x:[N,Ci] bf16  root_w:[Ci,Co] bf16  bias:[1,Co] f32  A:[R,N,N] bf16  W:[R,Ci,Co] bf16."""
    N, C_in = x.shape
    C_out = root_w.shape[1]
    R = W.shape[0]
    num_tiles = N // tm
    num_k = N // tk

    # Hoisted per-relation feature transform (computed once per layer, bf16).
    XR = rel_transform(x, W, tn=tk)

    kernel = functools.partial(_rgcn_agg_kernel, apply_relu=apply_relu)

    # DMA-skip index_maps: for empty blocks return the indices of the last
    # non-empty block (precomputed in SMEM) so Pallas re-uses the resident
    # buffer and issues no copy.
    def a_map(i, r, k, m, ei, er, ek):
        p = (i * R + r) * num_k + k
        return (er[p], ei[p], ek[p])

    def xr_map(i, r, k, m, ei, er, ek):
        p = (i * R + r) * num_k + k
        return (er[p], ek[p], 0)

    return pl.pallas_call(
        kernel,
        out_shape=jax.ShapeDtypeStruct((N, C_out), out_dtype),
        grid_spec=pltpu.PrefetchScalarGridSpec(
            num_scalar_prefetch=4,                       # mask + effective block indices -> SMEM
            grid=(num_tiles, R, num_k),
            in_specs=[
                pl.BlockSpec((tm, C_in), lambda i, r, k, m, ei, er, ek: (i, 0)),        # x row tile
                pl.BlockSpec((C_in, C_out), lambda i, r, k, m, ei, er, ek: (0, 0)),     # W_root
                pl.BlockSpec((1, C_out), lambda i, r, k, m, ei, er, ek: (0, 0)),        # bias (f32)
                pl.BlockSpec((1, tm, tk), a_map),                                       # A[r] block
                pl.BlockSpec((1, tk, C_out), xr_map),                                   # XR[r] slab
            ],
            out_specs=pl.BlockSpec((tm, C_out), lambda i, r, k, m, ei, er, ek: (i, 0)),
            scratch_shapes=[pltpu.VMEM((tm, C_out), jnp.float32)],                      # f32 accumulator
        ),
        compiler_params=pltpu.CompilerParams(
            dimension_semantics=("parallel", "arbitrary", "arbitrary"),
            vmem_limit_bytes=_vmem_limit(),
        ),
    )(block_mask, eff_i, eff_r, eff_k, x, root_w, bias, A, XR)


# ------------------------------------ plain-JAX glue ---------------------------------------- #

def build_rel_adj(edge_index, edge_type, num_nodes, num_relations):
    """Dense per-relation mean-normalized adjacency A[r, dst, src] (f32)."""
    src = edge_index[0]
    dst = edge_index[1]
    counts = jnp.zeros((num_relations, num_nodes, num_nodes), jnp.float32)
    counts = counts.at[edge_type, dst, src].add(1.0)
    deg = counts.sum(axis=2, keepdims=True)               # #edges of type r into node i
    return counts / jnp.maximum(deg, 1.0)                  # zero rows stay zero


def init_rgcn_params(key, in_channels, out_channels, num_relations, num_layers):
    """Deterministic synthetic init (same shapes as torch RGCNConv params)."""
    params = []
    c_in = in_channels
    for _ in range(num_layers):
        key, k1, k2, k3 = jax.random.split(key, 4)
        W = 0.1 * jax.random.normal(k1, (num_relations, c_in, out_channels), jnp.float32)
        root = 0.1 * jax.random.normal(k2, (c_in, out_channels), jnp.float32)
        bias = 0.1 * jax.random.normal(k3, (1, out_channels), jnp.float32)
        params.append((W, root, bias))
        c_in = out_channels
    return params


def rgcn_forward(x, edge_index, edge_type, params, num_nodes, num_relations):
    N, C_in = x.shape
    C_out = params[0][1].shape[1]

    # Padded geometry: lane-dense channels (x128); dst tile tm, src tile tk (pow2, divide N_pad).
    tm, tk, N_pad = _pick_tiles(N)
    C_in_pad = _round_up(C_in, 128)
    C_out_pad = _round_up(C_out, 128)
    num_tiles = N_pad // tm
    num_k = N_pad // tk

    A = build_rel_adj(edge_index, edge_type, num_nodes, num_relations)
    A_pad = jnp.pad(A, ((0, 0), (0, N_pad - N), (0, N_pad - N))).astype(jnp.bfloat16)

    # Per-(dst-tile, relation, src-tile) nonempty-block mask in grid order (i, r, k).
    blocks = A_pad.astype(jnp.float32).reshape(num_relations, num_tiles, tm, num_k, tk)
    mask3 = (jnp.abs(blocks).sum(axis=(2, 4)) > 0.0)                 # [R, num_tiles, num_k]
    block_mask = jnp.transpose(mask3, (1, 0, 2)).reshape(-1).astype(jnp.int32)

    # Effective (DMA-skip) block indices: for an empty block, point at the most
    # recent non-empty block so the index_map repeats it and Pallas issues no copy.
    P = block_mask.shape[0]
    pos = jnp.arange(P, dtype=jnp.int32)
    marked = jnp.where(block_mask != 0, pos, jnp.int32(-1))
    last_ne = lax.cummax(marked, axis=0)
    eff = jnp.where(last_ne >= 0, last_ne, pos)
    eff_i = (eff // (num_relations * num_k)).astype(jnp.int32)
    eff_r = ((eff // num_k) % num_relations).astype(jnp.int32)
    eff_k = (eff % num_k).astype(jnp.int32)

    # Padded feature rows become `bias` (then ReLU'd) after each layer; harmless
    # because padded A columns are zero and the rows are sliced off at the end.
    h = jnp.pad(x, ((0, N_pad - N), (0, C_in_pad - C_in))).astype(jnp.bfloat16)

    # TODO(synk): for very large graphs, replace the dense [R,N,N] adjacency with a
    # padded-CSR / gathered-neighbor formulation via data-dependent index_maps so DMA
    # and FLOPs scale with the edge count instead of N^2.

    num_layers = len(params)
    c_prev = C_in
    for l, (W, root, bias) in enumerate(params):
        c_prev_pad = _round_up(c_prev, 128)
        W_pad = jnp.pad(W, ((0, 0), (0, c_prev_pad - c_prev),
                            (0, C_out_pad - C_out))).astype(jnp.bfloat16)
        root_pad = jnp.pad(root, ((0, c_prev_pad - c_prev),
                                  (0, C_out_pad - C_out))).astype(jnp.bfloat16)
        bias_pad = jnp.pad(bias, ((0, 0), (0, C_out_pad - C_out)))      # stays f32
        last = (l == num_layers - 1)
        h = rgcn_layer(h, root_pad, bias_pad, A_pad, W_pad,
                       block_mask, eff_i, eff_r, eff_k,
                       tm=tm, tk=tk,
                       apply_relu=not last,
                       out_dtype=jnp.float32 if last else jnp.bfloat16)
        c_prev = C_out
    return h[:N, :C_out]


def rgcn_forward_ref(x, A, params):
    """Pure-JAX reference mirroring the kernel's bf16 rounding points (f32 accumulation)."""
    def bf(t):
        return t.astype(jnp.bfloat16).astype(jnp.float32)

    A_ = bf(A)
    h = bf(x)
    num_layers = len(params)
    for l, (W, root, bias) in enumerate(params):
        XR = jnp.einsum('nc,rcd->rnd', h, bf(W))
        XR = bf(XR)                                      # XR is materialized in bf16
        out = h @ bf(root) + bias + jnp.einsum('rij,rjd->id', A_, XR)
        if l < num_layers - 1:
            out = jnp.maximum(out, 0.0)
            h = bf(out)                                  # intermediate layer output is bf16
        else:
            h = out
    return h


# ---------------------------------------- main ----------------------------------------------- #

if __name__ == "__main__":
    key = jax.random.PRNGKey(0)
    N, C_IN, C_OUT, R, L, E = 16, 8, 16, 3, 2, 40

    k_x, k_src, k_dst, k_t, k_p = jax.random.split(key, 5)
    x = jax.random.normal(k_x, (N, C_IN), jnp.float32)
    src = jax.random.randint(k_src, (E,), 0, N)
    dst = jax.random.randint(k_dst, (E,), 0, N)
    edge_index = jnp.stack([src, dst], axis=0)        # [2, E] like torch.stack
    edge_type = jax.random.randint(k_t, (E,), 0, R)   # [E]

    params = init_rgcn_params(k_p, C_IN, C_OUT, R, L)

    out = rgcn_forward(x, edge_index, edge_type, params, N, R)
    out = jax.block_until_ready(out)

    A = build_rel_adj(edge_index, edge_type, N, R)
    ref = rgcn_forward_ref(x, A, params)
    assert out.shape == (N, C_OUT)
    assert jnp.allclose(out, ref, atol=3e-2, rtol=3e-2), "mismatch vs reference"

    print("KERNEL_OK")
</pallas_src>

<mosaic_0001>
module attributes {stable_mosaic.version = 11 : i64} {
  func.func @_rel_transform_kernel(%arg0: i32, %arg1: i32, %arg2: memref<128x128xbf16, #tpu.memory_space<vmem>>, %arg3: memref<1x128x128xbf16, #tpu.memory_space<vmem>>, %arg4: memref<1x128x128xbf16, #tpu.memory_space<vmem>>) attributes {dimension_semantics = [#tpu.dimension_semantics<parallel>, #tpu.dimension_semantics<parallel>], iteration_bounds = array<i64: 3, 1>, scalar_prefetch = 0 : i64, scratch_operands = 0 : i64, tpu.core_type = #tpu.core_type<tc>, window_params = [{transform_indices = @transform_0, window_bounds = array<i64: 128, 128>}, {transform_indices = @transform_1, window_bounds = array<i64: 1, 128, 128>}, {transform_indices = @transform_2, window_bounds = array<i64: 1, 128, 128>}]} {
    %c0 = arith.constant 0 : index
    %c0_0 = arith.constant 0 : index
    %0 = vector.load %arg2[%c0, %c0_0] : memref<128x128xbf16, #tpu.memory_space<vmem>>, vector<128x128xbf16>
    %c0_1 = arith.constant 0 : index
    %c0_2 = arith.constant 0 : index
    %c0_3 = arith.constant 0 : index
    %1 = vector.load %arg3[%c0_1, %c0_2, %c0_3] : memref<1x128x128xbf16, #tpu.memory_space<vmem>>, vector<1x128x128xbf16>
    %2 = vector.shape_cast %1 : vector<1x128x128xbf16> to vector<128x128xbf16>
    %cst = arith.constant dense<0.000000e+00> : vector<128x128xf32>
    %3 = tpu.matmul %0, %2, %cst {dimension_numbers = #tpu.dot_dimension_numbers<[1], [0], [0], [1], [0, 0, 1, 1], [], []>} : vector<128x128xbf16>, vector<128x128xbf16>, vector<128x128xf32> -> vector<128x128xf32>
    %4 = arith.truncf %3 : vector<128x128xf32> to vector<128x128xbf16>
    %c0_4 = arith.constant 0 : index
    %c0_5 = arith.constant 0 : index
    %c0_6 = arith.constant 0 : index
    %5 = vector.load %arg4[%c0_4, %c0_5, %c0_6] : memref<1x128x128xbf16, #tpu.memory_space<vmem>>, vector<1x128x128xbf16>
    %6 = vector.shape_cast %5 : vector<1x128x128xbf16> to vector<128x128xbf16>
    %7 = vector.shape_cast %4 : vector<128x128xbf16> to vector<1x128x128xbf16>
    tpu.vector_store %arg4[%c0_4, %c0_5, %c0_6], %7 {strides = array<i32>} : memref<1x128x128xbf16, #tpu.memory_space<vmem>>, vector<1x128x128xbf16>,
    return
  }
  func.func @transform_0(%arg0: i32, %arg1: i32) -> (i32, i32) {
    %c0_i32 = arith.constant 0 : i32
    %c0_i32_0 = arith.constant 0 : i32
    return %arg1, %c0_i32 : i32, i32
  }
  func.func @transform_1(%arg0: i32, %arg1: i32) -> (i32, i32, i32) {
    %c0_i32 = arith.constant 0 : i32
    %c0_i32_0 = arith.constant 0 : i32
    %c0_i32_1 = arith.constant 0 : i32
    return %arg0, %c0_i32, %c0_i32_0 : i32, i32, i32
  }
  func.func @transform_2(%arg0: i32, %arg1: i32) -> (i32, i32, i32) {
    %c0_i32 = arith.constant 0 : i32
    %c0_i32_0 = arith.constant 0 : i32
    return %arg0, %arg1, %c0_i32 : i32, i32, i32
  }
}

</mosaic_0001>

<bundles_post_ra>
// kernel: tpu_custom_call.1
= control target key start
LH: loop header
LB: loop body
LE: loop exit
PB: predicated region body
PF: predicated region fallthrough
CT: control target
= control target key end

     0   :  { %7 = vsyncpa [#allocation3], 0  ;;  %s1297_s0 = inlined_call_operand.hbm [shape: bf16[128,128], index: 0, kind: input, shape index: {}]   ;;  %s1298_s1 = inlined_call_operand.hbm [shape: bf16[3,128,128], index: 1, kind: input, shape index: {}]   ;;  %s1299_s2 = inlined_call_operand.hbm [shape: bf16[3,128,128], index: 2, kind: output, shape index: {}]  }
   0x1   :  { %8 = vsyncpa [#allocation6], 0 }
   0x2   :  { %10 = vsyncpa [#allocation6 + $0x1], 0 }
   0x3   :  { %11 = vsyncpa [#allocation4], 0 }
   0x4   :  { %13 = vsyncpa [#allocation4 + $0x1], 0  ;;  %s1060_s9 = smov 0   ;;  %s1062_s10 = smov 0  }
   0x5   :  { %s1064_s11 = smov 0   ;;  %s1066_s12 = smov 0  }
   0x6   :  { %s1068_s13 = smov 0   ;;  %s1070_s14 = smov 0  }
   0x7 LB: > { %s621_s15 = sadd.s32 4294967295, %s1036_s14   ;;  %s622_s16 = sadd.s32 4294967294, %s1036_s14   ;;  %s1036_s14 = sphi %s1070_s14, %s19_s14   ;;  %s1032_s13 = sphi %s1068_s13, %s1322_s13   ;;  %s1028_s12 = sphi %s1066_s12, %s1321_s12   ;;  %s1024_s11 = sphi %s1064_s11, %s1320_s11   ;;  %s1020_s10 = sphi %s1062_s10, %s1319_s10   ;;  %s1016_s9 = sphi %s1060_s9, %s1318_s9  }
   0x8   : > { %p77_p0 = scmp.ne.s32.totalorder %s1020_s10, %s1016_s9  ;;  %p1094_p1 = scmp.eq.s32.totalorder %s621_s15, 0 }
   0x9   : > { %p1098_p2 = scmp.eq.s32.totalorder %s621_s15, 2  ;;  %p109_p3 = scmp.eq.s32.totalorder %s622_s16, 2 }
   0xa   : > { %s1304_s17 = scalar_select %p1094_p1, 1, 0 }
   0xb   : > { %s1305_s18 = scalar_select %p1098_p2, 1, 0 }
   0xc   : > { %p1104_p4 = por %p1094_p1, %p77_p0  ;;  %p623_p5 = scmp.ge.s32.totalorder %s1036_s14, 1 }
   0xd   : > { %p1109_p6 = por %p109_p3, %p77_p0  ;;  %p116_p7 = scmp.lt.s32.totalorder %s1036_s14, 4 }
   0xe   : > { %s1306_s19 = scalar_select %p1104_p4, 1, 0 }
   0xf   : > { %s1307_s20 = scalar_select %p1109_p6, 1, 0 }
  0x10   : > { %p1114_p8 = pnand %p623_p5, %p116_p7  ;;  %s1038_s22 = smov [#allocation2]  }
  0x11   : > { %s131_s23 = sshll.u32 %s1038_s22, 4  ;;  %s31_s25 = sadd.s32 1, %s1032_s13  ;;  %s132_s23 = int_to_ptr.vmem [resolvable:$true] %s131_s23 }
  0x12   : > { %s1308_s21 = scalar_select %p1114_p8, 1, 0 }
  0x13   : > { %p807_p9 = pneg %p1114_p8  ;;  %s892_s28 = scalar_lea.hbm %s1297_s0, 1024 }
  0x14   : > { %p893_p11 = scmp.ne.s32.totalorder %s1297_s0, %s892_s28  ;;  %p899_p3 = scmp.lt.u32.totalorder %s892_s28, %s1297_s0 }
  0x15   : > { %p1122_p10 = pnand %p807_p9, %p1094_p1 }
  0x17   : > { %p894_p12 = pneg %p1122_p10 }
  0x19   : > { %p895_p13 = pnand %p894_p12, %p893_p11 }
  0x1b   : > { %p896_p0 = pneg %p895_p13 }
  0x1d   : > { %p901_p5 = pnand %p899_p3, %p896_p0 }
  0x1f   : > { %904 = shalt.err (!%p901_p5)
}
  0x20   : > { %s905_s5 = scalar_lea.vmem %s132_s23, 1024  ;;  %p913_p4 = scmp.lt.s32.totalorder %s132_s23, %s132_s23 }
  0x21   : > { %p906_p7 = scmp.ne.s32.totalorder %s132_s23, %s905_s5  ;;  %p914_p1 = scmp.lt.s32.totalorder %s905_s5, %s905_s5 }
  0x23   : > { %p908_p9 = pnand %p906_p7, %p894_p12  ;;  %p915_p8 = por %p914_p1, %p913_p4 }
  0x25   : > { %p909_p6 = pneg %p908_p9 }
  0x27   : > { %p916_p2 = pnand %p915_p8, %p909_p6 }
  0x29   : > { %919 = shalt.err (!%p916_p2)
}
  0x2a   : > { %s1039_s6 = smov 64   ;;  %s1040_s7 = smov 4  }
  0x2b   : > { %810 = dma.hbm_to_vmem [thread:$0]  (!%p1122_p10), %s1297_s0, 1024, %s132_s23, [#allocation3], %s1039_s6, %s1039_s6, %s1040_s7  }
  0x2c   : > { %p33_p1 = scmp.ge.s32.totalorder %s31_s25, 3  ;;  %s64_s16 = sadd.s32 1, %s1024_s11 }
  0x2d   : > { %p71_p2 = scmp.ne.s32.totalorder %s1024_s11, %s1020_s10  ;;  %p72_p4 = scmp.eq.s32.totalorder %s1036_s14, 0 }
  0x2e   : > { %s1324_s25 = smov (%p33_p1, %s31_s25), 0  ;;  %p1311_p8 = scmp.ne.s32.totalorder %s1305_s18, 0 }
  0x2f   : > { %p1152_p6 = por %p72_p4, %p71_p2  ;;  %s61_s26 = ssub.s32 %s1032_s13, %s1324_s25 }
  0x30   : > { %p1158_p11 = por %p1311_p8, %p71_p2  ;;  %p820_p12 = scmp.lt.s32.totalorder %s1036_s14, 3 }
  0x31   : > { %p62_p10 = scmp.eq.s32.totalorder %s61_s26, 0  ;;  %s145_s23 = sand.u32 1, %s1024_s11  }
  0x32   : > { %s626_s27 = sshll.u32 %s145_s23, 6  ;;  %s670_s29 = sshll.u32 %s1032_s13, 10 }
  0x33   : > { %s1167_s28 = scalar_select %p62_p10, %s1024_s11, %s64_s16  }
  0x34   : > { %s1173_s4 = scalar_lea.hbm %s1298_s1, %s670_s29  ;;  %s149_s18 = scalar_lea.vmem [#allocation5], %s626_s27 }
  0x35   : > { %s156_s5 = sshll.u32 %s149_s18, 4  ;;  %p1179_p13 = pnand %p820_p12, %p1152_p6  ;;  %s1175_s5 = int_to_ptr.vmem [resolvable:$true] %s156_s5 }
  0x36   : > { %s1183_s15 = scalar_lea.sflag [#allocation6], %s145_s23  ;;  %s920_s16 = scalar_lea.hbm %s1173_s4, 1024 }
  0x37   : > { %p921_p0 = scmp.ne.s32.totalorder %s1173_s4, %s920_s16  ;;  %p922_p3 = pneg %p1179_p13 }
  0x38   : > { %s925_s22 = scalar_lea.hbm %s1298_s1, 3072  ;;  %p926_p9 = scmp.lt.u32.totalorder %s1173_s4, %s1298_s1 }
  0x39   : > { %p923_p5 = pnand %p922_p3, %p921_p0  ;;  %p927_p1 = scmp.lt.u32.totalorder %s925_s22, %s920_s16 }
  0x3a   : > { %p929_p4 = scmp.lt.u32.totalorder %s920_s16, %s1173_s4 }
  0x3b   : > { %p924_p7 = pneg %p923_p5  ;;  %p928_p2 = por %p927_p1, %p926_p9 }
  0x3d   : > { %p930_p6 = por %p929_p4, %p928_p2 }
  0x3f   : > { %p931_p8 = pnand %p930_p6, %p924_p7 }
  0x41   : > { %934 = shalt.err (!%p931_p8)
}
  0x42   : > { %s935_s23 = scalar_lea.vmem %s1175_s5, 1024  ;;  %s1041_s3 = smov [#allocation5]  }
  0x43   : > { %p936_p12 = scmp.ne.s32.totalorder %s1175_s5, %s935_s23  ;;  %s940_s18 = sshll.u32 %s1041_s3, 4  ;;  %s941_s18 = int_to_ptr.vmem [resolvable:$false] %s940_s18 }
  0x44   : > { %s942_s26 = scalar_lea.vmem %s941_s18, 2048  ;;  %p943_p5 = scmp.lt.s32.totalorder %s1175_s5, %s941_s18 }
  0x45   : > { %p938_p10 = pnand %p936_p12, %p922_p3  ;;  %p944_p9 = scmp.lt.s32.totalorder %s942_s26, %s935_s23 }
  0x47   : > { %p939_p0 = pneg %p938_p10  ;;  %p945_p1 = por %p944_p9, %p943_p5 }
  0x49   : > { %p946_p2 = pnand %p945_p1, %p939_p0 }
  0x4b   : > { %949 = shalt.err (!%p946_p2)
}
  0x4c   : > { %814 = dma.hbm_to_vmem [thread:$0]  (!%p1179_p13), %s1173_s4, 1024, %s1175_s5, %s1183_s15, %s1039_s6, %s1039_s6, %s1040_s7  }
  0x4d   : > { %p1314_p3 = scmp.ne.s32.totalorder %s1308_s21, 0 }
  0x4e   : > { %p1315_p7 = scmp.ne.s32.totalorder (!%p1314_p3), %s1304_s17, 0 }
  0x4f   : > { %168 = sbr.rel (%p1314_p3) target bundleno = 364 (0x16c), region = 28 }
  0x56   : > { %1003 = dma.done.wait (%p1315_p7), [#allocation3], 1024  }
  0x57   : > { %1005 = vsyncadd (%p1315_p7), [#allocation3], 4294966272  ;;  %s1221_s16 = sand.u32 1, %s1020_s10   ;;  %p1316_p13 = scmp.ne.s32.totalorder %s1306_s19, 0 }
  0x58   : > { %s631_s8 = sshll.u32 %s1221_s16, 6  ;;  %s175_s27 = scalar_lea.sflag [#allocation6], %s1221_s16 }
  0x59   : > { %s1227_s6 = scalar_lea.vmem [#allocation5], %s631_s8 }
  0x5a   : > { %1007 = dma.done.wait (%p1316_p13), %s175_s27, 1024  }
  0x5b   : > { %1009 = vsyncadd (%p1316_p13), %s175_s27, 4294966272  ;;  %v876_v0 = vld [vmem:[%s1227_s6] sm:$0xff]   ;;  %v877_v1 = vld [vmem:[%s1227_s6 + $0x8] sm:$0xff]   ;;  %s198_s17 = scalar_lea.vmem [#allocation7], %s631_s8  ;;  %s687_s21 = sshll.u32 %s1028_s12, 10 }
  0x5c   : > { %751 = vmatprep.subr.bf16.mxu0 %v876_v0  ;;  %783 = vmatprep.subr.bf16.mxu1 %v876_v0  ;;  %v878_v2 = vld [vmem:[%s1227_s6 + $0x10] sm:$0xff]   ;;  %v879_v3 = vld [vmem:[%s1227_s6 + $0x18] sm:$0xff]   ;;  %v884_v4 = vld [vmem:[#allocation2] sm:$0xff]   ;;  %s523_s19 = sshll.u32 %s198_s17, 4  ;;  %s1249_s5 = scalar_lea.hbm %s1299_s2, %s687_s21  ;;  %s1244_s19 = int_to_ptr.vmem [resolvable:$true] %s523_s19 }
  0x5d   : > { %752 = vmatpush3.bf16.msra.mxu0 %v876_v0  ;;  %791 = vmatpush3.bf16.msra.mxu1 %v876_v0  ;;  %v885_v5 = vld [vmem:[#allocation2 + $0x20] sm:$0xff]   ;;  %v881_v7 = vld [vmem:[%s1227_s6 + $0x28] sm:$0xff]   ;;  %v882_v8 = vld [vmem:[%s1227_s6 + $0x30] sm:$0xff]   ;;  %s508_s12 = scalar_lea.sflag [#allocation4], %s1221_s16  ;;  %s950_s15 = scalar_lea.vmem %s1244_s19, 1024 }
  0x5e   : > { %753 = vmatprep.subr.bf16.mxu0 %v877_v1  ;;  %784 = vmatprep.subr.bf16.mxu1 %v877_v1  ;;  %v880_v6 = vld [vmem:[%s1227_s6 + $0x20] sm:$0xff]   ;;  %v883_v9 = vld [vmem:[%s1227_s6 + $0x38] sm:$0xff]   ;;  %v886_v10 = vld [vmem:[#allocation2 + $0x8] sm:$0xff]   ;;  %p951_p4 = scmp.ne.s32.totalorder %s1244_s19, %s950_s15  ;;  %s1042_s22 = smov [#allocation7]  }
  0x5f   : > { %767 = vmatprep.mubr.bf16.mxu0 %v884_v4  ;;  %775 = vmatprep.mubr.bf16.mxu1 %v885_v5  ;;  %v887_v11 = vld [vmem:[#allocation2 + $0x28] sm:$0xff]   ;;  %v888_v12 = vld [vmem:[#allocation2 + $0x10] sm:$0xff]   ;;  %v890_v14 = vld [vmem:[#allocation2 + $0x18] sm:$0xff]   ;;  %s954_s29 = sshll.u32 %s1042_s22, 4  ;;  %s955_s29 = int_to_ptr.vmem [resolvable:$false] %s954_s29 }
  0x60   : > { %v889_v13 = vld [vmem:[#allocation2 + $0x30] sm:$0xff]   ;;  %v891_v15 = vld [vmem:[#allocation2 + $0x38] sm:$0xff]   ;;  %p952_p6 = pnand %p951_p4, %p1158_p11  ;;  %s956_s30 = scalar_lea.vmem %s955_s29, 2048 }
  0x61   : > { %754 = vmatpush3.bf16.msra.mxu0 %v877_v1  ;;  %792 = vmatpush3.bf16.msra.mxu1 %v877_v1  ;;  %p957_p12 = scmp.lt.s32.totalorder %s1244_s19, %s955_s29  ;;  %p958_p10 = scmp.lt.s32.totalorder %s956_s30, %s950_s15 }
  0x62   : > { %755 = vmatprep.subr.bf16.mxu0 %v878_v2  ;;  %785 = vmatprep.subr.bf16.mxu1 %v878_v2  ;;  %p953_p8 = pneg %p952_p6 }
  0x63   : > { %p959_p0 = por %p958_p10, %p957_p12 }
  0x65   : > { %756 = vmatpush3.bf16.msra.mxu0 %v878_v2  ;;  %793 = vmatpush3.bf16.msra.mxu1 %v878_v2  ;;  %p960_p5 = pnand %p959_p0, %p953_p8 }
  0x66   : > { %757 = vmatprep.subr.bf16.mxu0 %v879_v3  ;;  %786 = vmatprep.subr.bf16.mxu1 %v879_v3 }
  0x69   : > { %758 = vmatpush3.bf16.msra.mxu0 %v879_v3  ;;  %794 = vmatpush3.bf16.msra.mxu1 %v879_v3 }
  0x6a   : > { %759 = vmatprep.subr.bf16.mxu0 %v880_v6  ;;  %787 = vmatprep.subr.bf16.mxu1 %v880_v6 }
  0x6d   : > { %760 = vmatpush3.bf16.msra.mxu0 %v880_v6  ;;  %795 = vmatpush3.bf16.msra.mxu1 %v880_v6 }
  0x6e   : > { %761 = vmatprep.subr.bf16.mxu0 %v881_v7  ;;  %788 = vmatprep.subr.bf16.mxu1 %v881_v7 }
  0x71   : > { %762 = vmatpush3.bf16.msra.mxu0 %v881_v7  ;;  %796 = vmatpush3.bf16.msra.mxu1 %v881_v7 }
  0x72   : > { %763 = vmatprep.subr.bf16.mxu0 %v882_v8  ;;  %789 = vmatprep.subr.bf16.mxu1 %v882_v8 }
  0x75   : > { %764 = vmatpush3.bf16.msra.mxu0 %v882_v8  ;;  %797 = vmatpush3.bf16.msra.mxu1 %v882_v8 }
  0x76   : > { %765 = vmatprep.subr.bf16.mxu0 %v883_v9  ;;  %790 = vmatprep.subr.bf16.mxu1 %v883_v9 }
  0x79   : > { %766 = vmatpush3.bf16.msra.mxu0 %v883_v9  ;;  %798 = vmatpush3.bf16.msra.mxu1 %v883_v9 }
  0x7c   : > { %768 = vmatmul.mubr.bf16.vlgmr.msra.gmra.mrb[0].mxu0 %v886_v10  ;;  %776 = vmatmul.mubr.bf16.vlgmr.msra.gmra.mrb[0].mxu1 %v887_v11 }
  0x7d   : > { %771 = vmatprep.mubr.bf16.mxu0 %v888_v12  ;;  %779 = vmatprep.mubr.bf16.mxu1 %v889_v13 }
  0x84   : > { %772 = vmatmul.mubr.bf16.gmra.mrb[4].mxu0 %v890_v14  ;;  %780 = vmatmul.mubr.bf16.gmra.mrb[4].mxu1 %v891_v15 }
 0x14f   : > { %v769_v16 = vpop.f32.mrb[0].mxu0  ;;  %v777_v17 = vpop.f32.mrb[0].mxu1 }
 0x150   : > { %v364_v18 = vpop.f32.mrb[1].mxu0  ;;  %v396_v19 = vpop.f32.mrb[1].mxu1 }
 0x151   : > { %v770_v20 = vpop.f32.mrb[2].mxu0  ;;  %v778_v21 = vpop.f32.mrb[2].mxu1 }
 0x152   : > { %v696_v22 = vpack.c.bf16 %v770_v20, %v769_v16  ;;  %v716_v23 = vpack.c.bf16 %v778_v21, %v777_v17  ;;  %v367_v24 = vpop.f32.mrb[3].mxu0  ;;  %v399_v25 = vpop.f32.mrb[3].mxu1 }
 0x153   : > { %v691_v26 = vpack.c.bf16 %v367_v24, %v364_v18  ;;  %v711_v27 = vpack.c.bf16 %v399_v25, %v396_v19 }
 0x154   : > { %728 = vst [vmem:[%s198_s17 + $0x8] sm:$0xff] %v696_v22   ;;  %732 = vst [vmem:[%s198_s17 + $0x28] sm:$0xff] %v716_v23  }
 0x155   : > { %692 = vst [vmem:[%s198_s17] sm:$0xff] %v691_v26   ;;  %731 = vst [vmem:[%s198_s17 + $0x20] sm:$0xff] %v711_v27  }
 0x157   : > { %v773_v28 = vpop.f32.mrb[4].mxu0  ;;  %v781_v29 = vpop.f32.mrb[4].mxu1 }
 0x158   : > { %v380_v30 = vpop.f32.mrb[5].mxu0  ;;  %v412_v31 = vpop.f32.mrb[5].mxu1 }
 0x159   : > { %v774_v32 = vpop.f32.mrb[6].mxu0  ;;  %v782_v33 = vpop.f32.mrb[6].mxu1 }
 0x15a   : > { %v706_v34 = vpack.c.bf16 %v774_v32, %v773_v28  ;;  %v726_v35 = vpack.c.bf16 %v782_v33, %v781_v29  ;;  %v383_v36 = vpop.f32.mrb[7].mxu0  ;;  %v415_v37 = vpop.f32.mrb[7].mxu1 }
 0x15b   : > { %v701_v38 = vpack.c.bf16 %v383_v36, %v380_v30  ;;  %v721_v39 = vpack.c.bf16 %v415_v37, %v412_v31 }
 0x15c   : > { %730 = vst [vmem:[%s198_s17 + $0x18] sm:$0xff] %v706_v34   ;;  %734 = vst [vmem:[%s198_s17 + $0x38] sm:$0xff] %v726_v35  }
 0x15d   : > { %729 = vst [vmem:[%s198_s17 + $0x10] sm:$0xff] %v701_v38   ;;  %733 = vst [vmem:[%s198_s17 + $0x30] sm:$0xff] %v721_v39  }
 0x15e   : > { %963 = shalt.err (!%p960_p5)
}
 0x15f   : > { %s964_s23 = scalar_lea.hbm %s1249_s5, 1024  ;;  %s968_s26 = scalar_lea.hbm %s1299_s2, 3072 }
 0x160   : > { %p965_p9 = scmp.ne.s32.totalorder %s1249_s5, %s964_s23  ;;  %p969_p3 = scmp.lt.u32.totalorder %s1249_s5, %s1299_s2 }
 0x161   : > { %p970_p7 = scmp.lt.u32.totalorder %s968_s26, %s964_s23  ;;  %p972_p4 = scmp.lt.u32.totalorder %s964_s23, %s1249_s5 }
 0x162   : > { %p966_p1 = pnand %p965_p9, %p1158_p11 }
 0x163   : > { %p971_p13 = por %p970_p7, %p969_p3 }
 0x164   : > { %p967_p2 = pneg %p966_p1 }
 0x165   : > { %p973_p6 = por %p972_p4, %p971_p13 }
 0x167   : > { %p974_p8 = pnand %p973_p6, %p967_p2 }
 0x169   : > { %977 = shalt.err (!%p974_p8)
}
 0x16a   : > { %s1043_s6 = smov 64   ;;  %s1044_s17 = smov 4  }
 0x16b   : > { %805 = dma.vmem_to_hbm [thread:$0]  (%p1158_p11), %s1244_s19, 1024, %s1249_s5, %s508_s12, %s1043_s6, %s1043_s6, %s1044_s17  }
 0x16c PF: > { %p822_p12 = scmp.ge.s32.totalorder %s1036_s14, 2  ;;  %s538_s21 = sand.u32 1, %s1016_s9  }
 0x16d   : > { %p1317_p10 = scmp.ne.s32.totalorder %s1307_s20, 0  ;;  %s539_s7 = scalar_lea.sflag [#allocation4], %s538_s21 }
 0x16f   : > { %p816_p0 = pnand %p822_p12, %p1317_p10 }
 0x171   : > { %1011 = dma.done.wait (!%p816_p0), %s539_s7, 1024  }
 0x172   : > { %1013 = vsyncadd (!%p816_p0), %s539_s7, 4294966272  ;;  %s19_s14 = sadd.s32 1, %s1036_s14   ;;  %s1318_s9 = smov %s1020_s10 }
 0x173   : > { %p16_p5 = scmp.ge.s32.totalorder %s19_s14, 5   ;;  %s1319_s10 = smov %s1024_s11 }
 0x174   : > { %s1320_s11 = smov %s1167_s28  ;;  %s1321_s12 = smov %s1032_s13 }
 0x175   : > { %s1322_s13 = smov %s1324_s25  ;;  %18 = sbr.rel (!%p16_p5) target bundleno = 7 (0x7), region = 79 }
 0x17c   :  { %544 = vsyncpa [#allocation3], 1 }
 0x17d   :  { %546 = vsyncpa [#allocation3 + $0x1], 1 }
 0x17e   :  { %547 = vsyncpa [#allocation6], 1 }
 0x17f   :  { %549 = vsyncpa [#allocation6 + $0x1], 1 }
 0x180   :  { %550 = vsyncpa [#allocation4], 1 }
 0x181   :  { %552 = vsyncpa [#allocation4 + $0x1], 1 }

</bundles_post_ra>
